<compile_context>
chip_gen: v7x
topology: tpu7x:2x2x1
jax: 0.10.0
libtpu: 0.0.40
codegen_flags: <defaults>
</compile_context>

<pallas_src>
import math
import functools

import jax
import jax.numpy as jnp
from jax import lax
from jax.experimental import pallas as pl
from jax.experimental.pallas import tpu as pltpu


_MAX_TOKENS_PER_CALL = 32768          # bounds the scalar-prefetched SMEM id array
_VMEM_TABLE_BYTES_LIMIT = 8 * 1024 * 1024   # small-table fast path threshold
_VMEM_BUDGET_BYTES = 48 * 1024 * 1024       # safe across v5e/v6e/v7x (64 MiB)


def _round_up(x, m):
    return ((x + m - 1) // m) * m


# ---------------------------------------------------------------------------
# Fast path: table resident in VMEM, gather with in-VMEM dynamic row reads.
# ---------------------------------------------------------------------------
def _vmem_gather_kernel(tok_ref, tab_ref, out_ref, *, tile_n, scale):
    # tok_ref : (N_pad,)    int32  SMEM (scalar-prefetched token ids)
    # tab_ref : (V, E)      f32    VMEM-resident table (constant index_map)
    # out_ref : (tile_n, E) f32    VMEM output block (written in place, scaled)
    base = pl.program_id(0) * tile_n

    def gather_row(r):
        tok = tok_ref[base + r]
        out_ref[pl.ds(r, 1), :] = tab_ref[pl.ds(tok, 1), :] * scale

    if tile_n <= 32:                      # tiny tile: static unroll is fine
        for r in range(tile_n):
            gather_row(r)
    else:                                 # large tile: bounded unroll
        def body(r, carry):
            gather_row(r)
            return carry
        lax.fori_loop(0, tile_n, body, 0, unroll=8)


# ---------------------------------------------------------------------------
# Large-table path: table in HBM, manual row-DMA gather with cross-step
# double-buffering and a single aggregate semaphore wait per slot.
# ---------------------------------------------------------------------------
def _hbm_gather_kernel(tok_ref, emb_hbm, out_ref, buf, sems, *, tile_n, scale):
    # tok_ref : (N_pad,)        int32  SMEM (scalar-prefetched token ids)
    # emb_hbm : (V, E)          f32    HBM (pl.ANY) -- manual row-gather DMAs
    # out_ref : (tile_n, E)     f32    VMEM output block
    # buf     : (2, tile_n, E)  f32    gather slots (cross-step double buffer)
    # sems    : (2,)            DMA semaphores, one aggregate sem per slot
    o = pl.program_id(0)
    l = pl.program_id(1)
    n_inner = pl.num_programs(1)
    blk = o * n_inner + l
    slot = l % 2

    def issue(block_idx, slot_idx):
        base = block_idx * tile_n
        dst = buf.at[slot_idx]
        sem = sems.at[slot_idx]

        def issue_row(r):
            tok = tok_ref[base + r]
            pltpu.make_async_copy(
                emb_hbm.at[pl.ds(tok, 1), :],     # one (1, E) table row in HBM
                dst.at[pl.ds(r, 1), :],
                sem,
            ).start()

        if tile_n <= 32:                          # tiny tile: static unroll
            for r in range(tile_n):
                issue_row(r)
        else:                                     # large tile: bounded unroll
            def body(r, carry):
                issue_row(r)
                return carry
            lax.fori_loop(0, tile_n, body, 0, unroll=8)

    # Prime the pipeline on the first inner step of this chunk.
    @pl.when(l == 0)
    def _():
        issue(blk, slot)

    # Cross-step prefetch: start the next block's row DMAs into the other slot
    # BEFORE waiting on the current block, hiding gather latency.
    @pl.when(l + 1 < n_inner)
    def _():
        issue(blk + 1, 1 - slot)

    # Single aggregate wait: all tile_n row copies signal the same semaphore;
    # waiting with a descriptor whose dst is the full slot waits for the total
    # bytes (same pattern as the upstream paged-attention kernel).
    pltpu.make_async_copy(buf.at[slot], buf.at[slot], sems.at[slot]).wait()

    out_ref[...] = buf[slot] * scale              # f32 VPU scale, bit-exact


# ---------------------------------------------------------------------------
# Wrapper
# ---------------------------------------------------------------------------
def _token_embedding_chunk(tok_flat, emb_table, *, tile_n, gather_from_hbm, scale):
    N = tok_flat.shape[0]
    V, E = emb_table.shape
    table_bytes = V * E * 4

    # Tile sizing: multiple of 8, no larger than needed, capped by VMEM budget.
    tile_n = _round_up(max(8, min(tile_n, N)), 8)
    if gather_from_hbm:
        per_row = 16 * E                       # 2 gather slots + 2 out buffers
        avail = _VMEM_BUDGET_BYTES
    else:
        per_row = 8 * E                        # 2 output buffers
        avail = _VMEM_BUDGET_BYTES - 2 * table_bytes
    max_tile = max(8, (avail // per_row) // 8 * 8)
    tile_n = min(tile_n, max_tile)

    n_blocks = pl.cdiv(N, tile_n)
    if gather_from_hbm:
        n_outer = 2 if n_blocks >= 8 else 1    # shard outer axis over v7x's 2 TCs
        n_inner = pl.cdiv(n_blocks, n_outer)
        n_blocks = n_outer * n_inner
    else:
        n_outer, n_inner = 1, n_blocks

    N_pad = n_blocks * tile_n
    if N_pad != N:
        tok_flat = jnp.pad(tok_flat, (0, N_pad - N))   # pad with id 0 (valid row)

    block_bytes = tile_n * E * 4
    if gather_from_hbm:
        need = 4 * block_bytes
    else:
        need = 2 * table_bytes + 2 * block_bytes
    vmem_limit = int(max(16 * 1024 * 1024, need + 4 * 1024 * 1024))

    if gather_from_hbm:
        kernel = functools.partial(_hbm_gather_kernel, tile_n=tile_n, scale=scale)
        out_flat = pl.pallas_call(
            kernel,
            out_shape=jax.ShapeDtypeStruct((N_pad, E), jnp.float32),
            grid_spec=pltpu.PrefetchScalarGridSpec(
                num_scalar_prefetch=1,                       # ids -> SMEM
                grid=(n_outer, n_inner),
                in_specs=[pl.BlockSpec(memory_space=pl.ANY)],  # table stays in HBM
                out_specs=pl.BlockSpec(
                    (tile_n, E), lambda o, l, tok: (o * n_inner + l, 0)),
                scratch_shapes=[
                    pltpu.VMEM((2, tile_n, E), jnp.float32),
                    pltpu.SemaphoreType.DMA((2,)),
                ]),
            compiler_params=pltpu.CompilerParams(
                dimension_semantics=("parallel", "arbitrary"),
                vmem_limit_bytes=vmem_limit),
        )(tok_flat, emb_table)
    else:
        kernel = functools.partial(_vmem_gather_kernel, tile_n=tile_n, scale=scale)
        out_flat = pl.pallas_call(
            kernel,
            out_shape=jax.ShapeDtypeStruct((N_pad, E), jnp.float32),
            grid_spec=pltpu.PrefetchScalarGridSpec(
                num_scalar_prefetch=1,                       # ids -> SMEM
                grid=(n_blocks,),
                in_specs=[pl.BlockSpec((V, E), lambda i, tok: (0, 0))],  # VMEM-resident
                out_specs=pl.BlockSpec((tile_n, E), lambda i, tok: (i, 0)),
                scratch_shapes=[]),
            compiler_params=pltpu.CompilerParams(
                dimension_semantics=("parallel",),
                vmem_limit_bytes=vmem_limit),
        )(tok_flat, emb_table)

    return out_flat[:N]


def token_embedding(tokens, emb_table, *, tile_n=128, gather_from_hbm=None):
    """tokens: int array [...]; emb_table: [V, E] -> [..., E] float32."""
    orig_shape = tokens.shape
    emb_table = emb_table.astype(jnp.float32)
    V, E = emb_table.shape
    scale = math.sqrt(E)

    # TODO(synk): PyTorch nn.Embedding raises on out-of-range ids; we clamp.
    tok_flat = jnp.clip(tokens.astype(jnp.int32).reshape(-1), 0, V - 1)
    N_total = tok_flat.shape[0]

    if gather_from_hbm is None:
        gather_from_hbm = (V * E * 4) > _VMEM_TABLE_BYTES_LIMIT

    outs = []
    for start in range(0, N_total, _MAX_TOKENS_PER_CALL):
        chunk = tok_flat[start:start + _MAX_TOKENS_PER_CALL]
        outs.append(_token_embedding_chunk(
            chunk, emb_table, tile_n=tile_n,
            gather_from_hbm=gather_from_hbm, scale=scale))
    out = outs[0] if len(outs) == 1 else jnp.concatenate(outs, axis=0)
    return out.reshape(*orig_shape, E)


if __name__ == "__main__":
    key = jax.random.PRNGKey(0)
    k_emb, k_tok, k_emb2, k_tok2 = jax.random.split(key, 4)

    # --- 1) small-table fast path (table VMEM-resident) ---------------------
    vocab_size, emb_size = 128, 128
    batch, seq = 2, 8
    emb_table = jax.random.normal(k_emb, (vocab_size, emb_size), dtype=jnp.float32)
    tokens = jax.random.randint(k_tok, (batch, seq), 0, vocab_size, dtype=jnp.int32)

    out = jax.block_until_ready(token_embedding(tokens, emb_table))
    ref = emb_table[tokens] * math.sqrt(emb_size)
    assert out.shape == (batch, seq, emb_size)
    assert jnp.allclose(out, ref, atol=1e-6, rtol=1e-6)

    # --- 2) HBM-gather path (forced): exercises DMA gather, cross-step ------
    #        prefetch double-buffer and the aggregate semaphore wait.
    vocab2, emb2 = 2000, 256
    b2, s2 = 4, 96
    table2 = jax.random.normal(k_emb2, (vocab2, emb2), dtype=jnp.float32)
    tokens2 = jax.random.randint(k_tok2, (b2, s2), 0, vocab2, dtype=jnp.int32)

    out2 = jax.block_until_ready(
        token_embedding(tokens2, table2, gather_from_hbm=True))
    ref2 = table2[tokens2] * math.sqrt(emb2)
    assert out2.shape == (b2, s2, emb2)
    assert jnp.allclose(out2, ref2, atol=1e-6, rtol=1e-6)

    print("KERNEL_OK")
</pallas_src>

<mosaic_0001>
module attributes {stable_mosaic.version = 11 : i64} {
  func.func @_vmem_gather_kernel(%arg0: i32, %arg1: memref<16xi32, #tpu.memory_space<smem>>, %arg2: memref<128x128xf32, #tpu.memory_space<vmem>>, %arg3: memref<16x128xf32, #tpu.memory_space<vmem>>) attributes {dimension_semantics = [#tpu.dimension_semantics<parallel>], iteration_bounds = array<i64: 1>, scalar_prefetch = 1 : i64, scratch_operands = 0 : i64, tpu.core_type = #tpu.core_type<tc>, window_params = [{pipeline_mode = #tpu.pipeline_mode<synchronous>, transform_indices = @transform_0, window_bounds = array<i64: 128, 128>}, {transform_indices = @transform_1, window_bounds = array<i64: 16, 128>}]} {
    %c16_i32 = arith.constant 16 : i32
    %0 = arith.muli %arg0, %c16_i32 : i32
    %c0_i32 = arith.constant 0 : i32
    %1 = arith.addi %0, %c0_i32 : i32
    %2 = arith.index_cast %1 : i32 to index
    %3 = memref.load %arg1[%2] : memref<16xi32, #tpu.memory_space<smem>>
    %4 = arith.index_cast %3 : i32 to index
    %c0 = arith.constant 0 : index
    %5 = vector.load %arg2[%4, %c0] : memref<128x128xf32, #tpu.memory_space<vmem>>, vector<1x128xf32>
    %cst = arith.constant 11.3137083 : f32
    %6 = vector.broadcast %cst : f32 to vector<1x128xf32>
    %7 = arith.mulf %5, %6 : vector<1x128xf32>
    %c0_0 = arith.constant 0 : index
    %c0_1 = arith.constant 0 : index
    %8 = vector.load %arg3[%c0_0, %c0_1] : memref<16x128xf32, #tpu.memory_space<vmem>>, vector<1x128xf32>
    tpu.vector_store %arg3[%c0_0, %c0_1], %7 {strides = array<i32>} : memref<16x128xf32, #tpu.memory_space<vmem>>, vector<1x128xf32>,
    %c1_i32 = arith.constant 1 : i32
    %9 = arith.addi %0, %c1_i32 : i32
    %10 = arith.index_cast %9 : i32 to index
    %11 = memref.load %arg1[%10] : memref<16xi32, #tpu.memory_space<smem>>
    %12 = arith.index_cast %11 : i32 to index
    %c0_2 = arith.constant 0 : index
    %13 = vector.load %arg2[%12, %c0_2] : memref<128x128xf32, #tpu.memory_space<vmem>>, vector<1x128xf32>
    %cst_3 = arith.constant 11.3137083 : f32
    %14 = vector.broadcast %cst_3 : f32 to vector<1x128xf32>
    %15 = arith.mulf %13, %14 : vector<1x128xf32>
    %c1 = arith.constant 1 : index
    %c0_4 = arith.constant 0 : index
    %16 = vector.load %arg3[%c1, %c0_4] : memref<16x128xf32, #tpu.memory_space<vmem>>, vector<1x128xf32>
    tpu.vector_store %arg3[%c1, %c0_4], %15 {strides = array<i32>} : memref<16x128xf32, #tpu.memory_space<vmem>>, vector<1x128xf32>,
    %c2_i32 = arith.constant 2 : i32
    %17 = arith.addi %0, %c2_i32 : i32
    %18 = arith.index_cast %17 : i32 to index
    %19 = memref.load %arg1[%18] : memref<16xi32, #tpu.memory_space<smem>>
    %20 = arith.index_cast %19 : i32 to index
    %c0_5 = arith.constant 0 : index
    %21 = vector.load %arg2[%20, %c0_5] : memref<128x128xf32, #tpu.memory_space<vmem>>, vector<1x128xf32>
    %cst_6 = arith.constant 11.3137083 : f32
    %22 = vector.broadcast %cst_6 : f32 to vector<1x128xf32>
    %23 = arith.mulf %21, %22 : vector<1x128xf32>
    %c2 = arith.constant 2 : index
    %c0_7 = arith.constant 0 : index
    %24 = vector.load %arg3[%c2, %c0_7] : memref<16x128xf32, #tpu.memory_space<vmem>>, vector<1x128xf32>
    tpu.vector_store %arg3[%c2, %c0_7], %23 {strides = array<i32>} : memref<16x128xf32, #tpu.memory_space<vmem>>, vector<1x128xf32>,
    %c3_i32 = arith.constant 3 : i32
    %25 = arith.addi %0, %c3_i32 : i32
    %26 = arith.index_cast %25 : i32 to index
    %27 = memref.load %arg1[%26] : memref<16xi32, #tpu.memory_space<smem>>
    %28 = arith.index_cast %27 : i32 to index
    %c0_8 = arith.constant 0 : index
    %29 = vector.load %arg2[%28, %c0_8] : memref<128x128xf32, #tpu.memory_space<vmem>>, vector<1x128xf32>
    %cst_9 = arith.constant 11.3137083 : f32
    %30 = vector.broadcast %cst_9 : f32 to vector<1x128xf32>
    %31 = arith.mulf %29, %30 : vector<1x128xf32>
    %c3 = arith.constant 3 : index
    %c0_10 = arith.constant 0 : index
    %32 = vector.load %arg3[%c3, %c0_10] : memref<16x128xf32, #tpu.memory_space<vmem>>, vector<1x128xf32>
    tpu.vector_store %arg3[%c3, %c0_10], %31 {strides = array<i32>} : memref<16x128xf32, #tpu.memory_space<vmem>>, vector<1x128xf32>,
    %c4_i32 = arith.constant 4 : i32
    %33 = arith.addi %0, %c4_i32 : i32
    %34 = arith.index_cast %33 : i32 to index
    %35 = memref.load %arg1[%34] : memref<16xi32, #tpu.memory_space<smem>>
    %36 = arith.index_cast %35 : i32 to index
    %c0_11 = arith.constant 0 : index
    %37 = vector.load %arg2[%36, %c0_11] : memref<128x128xf32, #tpu.memory_space<vmem>>, vector<1x128xf32>
    %cst_12 = arith.constant 11.3137083 : f32
    %38 = vector.broadcast %cst_12 : f32 to vector<1x128xf32>
    %39 = arith.mulf %37, %38 : vector<1x128xf32>
    %c4 = arith.constant 4 : index
    %c0_13 = arith.constant 0 : index
    %40 = vector.load %arg3[%c4, %c0_13] : memref<16x128xf32, #tpu.memory_space<vmem>>, vector<1x128xf32>
    tpu.vector_store %arg3[%c4, %c0_13], %39 {strides = array<i32>} : memref<16x128xf32, #tpu.memory_space<vmem>>, vector<1x128xf32>,
    %c5_i32 = arith.constant 5 : i32
    %41 = arith.addi %0, %c5_i32 : i32
    %42 = arith.index_cast %41 : i32 to index
    %43 = memref.load %arg1[%42] : memref<16xi32, #tpu.memory_space<smem>>
    %44 = arith.index_cast %43 : i32 to index
    %c0_14 = arith.constant 0 : index
    %45 = vector.load %arg2[%44, %c0_14] : memref<128x128xf32, #tpu.memory_space<vmem>>, vector<1x128xf32>
    %cst_15 = arith.constant 11.3137083 : f32
    %46 = vector.broadcast %cst_15 : f32 to vector<1x128xf32>
    %47 = arith.mulf %45, %46 : vector<1x128xf32>
    %c5 = arith.constant 5 : index
    %c0_16 = arith.constant 0 : index
    %48 = vector.load %arg3[%c5, %c0_16] : memref<16x128xf32, #tpu.memory_space<vmem>>, vector<1x128xf32>
    tpu.vector_store %arg3[%c5, %c0_16], %47 {strides = array<i32>} : memref<16x128xf32, #tpu.memory_space<vmem>>, vector<1x128xf32>,
    %c6_i32 = arith.constant 6 : i32
    %49 = arith.addi %0, %c6_i32 : i32
    %50 = arith.index_cast %49 : i32 to index
    %51 = memref.load %arg1[%50] : memref<16xi32, #tpu.memory_space<smem>>
    %52 = arith.index_cast %51 : i32 to index
    %c0_17 = arith.constant 0 : index
    %53 = vector.load %arg2[%52, %c0_17] : memref<128x128xf32, #tpu.memory_space<vmem>>, vector<1x128xf32>
    %cst_18 = arith.constant 11.3137083 : f32
    %54 = vector.broadcast %cst_18 : f32 to vector<1x128xf32>
    %55 = arith.mulf %53, %54 : vector<1x128xf32>
    %c6 = arith.constant 6 : index
    %c0_19 = arith.constant 0 : index
    %56 = vector.load %arg3[%c6, %c0_19] : memref<16x128xf32, #tpu.memory_space<vmem>>, vector<1x128xf32>
    tpu.vector_store %arg3[%c6, %c0_19], %55 {strides = array<i32>} : memref<16x128xf32, #tpu.memory_space<vmem>>, vector<1x128xf32>,
    %c7_i32 = arith.constant 7 : i32
    %57 = arith.addi %0, %c7_i32 : i32
    %58 = arith.index_cast %57 : i32 to index
    %59 = memref.load %arg1[%58] : memref<16xi32, #tpu.memory_space<smem>>
    %60 = arith.index_cast %59 : i32 to index
    %c0_20 = arith.constant 0 : index
    %61 = vector.load %arg2[%60, %c0_20] : memref<128x128xf32, #tpu.memory_space<vmem>>, vector<1x128xf32>
    %cst_21 = arith.constant 11.3137083 : f32
    %62 = vector.broadcast %cst_21 : f32 to vector<1x128xf32>
    %63 = arith.mulf %61, %62 : vector<1x128xf32>
    %c7 = arith.constant 7 : index
    %c0_22 = arith.constant 0 : index
    %64 = vector.load %arg3[%c7, %c0_22] : memref<16x128xf32, #tpu.memory_space<vmem>>, vector<1x128xf32>
    tpu.vector_store %arg3[%c7, %c0_22], %63 {strides = array<i32>} : memref<16x128xf32, #tpu.memory_space<vmem>>, vector<1x128xf32>,
    %c8_i32 = arith.constant 8 : i32
    %65 = arith.addi %0, %c8_i32 : i32
    %66 = arith.index_cast %65 : i32 to index
    %67 = memref.load %arg1[%66] : memref<16xi32, #tpu.memory_space<smem>>
    %68 = arith.index_cast %67 : i32 to index
    %c0_23 = arith.constant 0 : index
    %69 = vector.load %arg2[%68, %c0_23] : memref<128x128xf32, #tpu.memory_space<vmem>>, vector<1x128xf32>
    %cst_24 = arith.constant 11.3137083 : f32
    %70 = vector.broadcast %cst_24 : f32 to vector<1x128xf32>
    %71 = arith.mulf %69, %70 : vector<1x128xf32>
    %c8 = arith.constant 8 : index
    %c0_25 = arith.constant 0 : index
    %72 = vector.load %arg3[%c8, %c0_25] : memref<16x128xf32, #tpu.memory_space<vmem>>, vector<1x128xf32>
    tpu.vector_store %arg3[%c8, %c0_25], %71 {strides = array<i32>} : memref<16x128xf32, #tpu.memory_space<vmem>>, vector<1x128xf32>,
    %c9_i32 = arith.constant 9 : i32
    %73 = arith.addi %0, %c9_i32 : i32
    %74 = arith.index_cast %73 : i32 to index
    %75 = memref.load %arg1[%74] : memref<16xi32, #tpu.memory_space<smem>>
    %76 = arith.index_cast %75 : i32 to index
    %c0_26 = arith.constant 0 : index
    %77 = vector.load %arg2[%76, %c0_26] : memref<128x128xf32, #tpu.memory_space<vmem>>, vector<1x128xf32>
    %cst_27 = arith.constant 11.3137083 : f32
    %78 = vector.broadcast %cst_27 : f32 to vector<1x128xf32>
    %79 = arith.mulf %77, %78 : vector<1x128xf32>
    %c9 = arith.constant 9 : index
    %c0_28 = arith.constant 0 : index
    %80 = vector.load %arg3[%c9, %c0_28] : memref<16x128xf32, #tpu.memory_space<vmem>>, vector<1x128xf32>
    tpu.vector_store %arg3[%c9, %c0_28], %79 {strides = array<i32>} : memref<16x128xf32, #tpu.memory_space<vmem>>, vector<1x128xf32>,
    %c10_i32 = arith.constant 10 : i32
    %81 = arith.addi %0, %c10_i32 : i32
    %82 = arith.index_cast %81 : i32 to index
    %83 = memref.load %arg1[%82] : memref<16xi32, #tpu.memory_space<smem>>
    %84 = arith.index_cast %83 : i32 to index
    %c0_29 = arith.constant 0 : index
    %85 = vector.load %arg2[%84, %c0_29] : memref<128x128xf32, #tpu.memory_space<vmem>>, vector<1x128xf32>
    %cst_30 = arith.constant 11.3137083 : f32
    %86 = vector.broadcast %cst_30 : f32 to vector<1x128xf32>
    %87 = arith.mulf %85, %86 : vector<1x128xf32>
    %c10 = arith.constant 10 : index
    %c0_31 = arith.constant 0 : index
    %88 = vector.load %arg3[%c10, %c0_31] : memref<16x128xf32, #tpu.memory_space<vmem>>, vector<1x128xf32>
    tpu.vector_store %arg3[%c10, %c0_31], %87 {strides = array<i32>} : memref<16x128xf32, #tpu.memory_space<vmem>>, vector<1x128xf32>,
    %c11_i32 = arith.constant 11 : i32
    %89 = arith.addi %0, %c11_i32 : i32
    %90 = arith.index_cast %89 : i32 to index
    %91 = memref.load %arg1[%90] : memref<16xi32, #tpu.memory_space<smem>>
    %92 = arith.index_cast %91 : i32 to index
    %c0_32 = arith.constant 0 : index
    %93 = vector.load %arg2[%92, %c0_32] : memref<128x128xf32, #tpu.memory_space<vmem>>, vector<1x128xf32>
    %cst_33 = arith.constant 11.3137083 : f32
    %94 = vector.broadcast %cst_33 : f32 to vector<1x128xf32>
    %95 = arith.mulf %93, %94 : vector<1x128xf32>
    %c11 = arith.constant 11 : index
    %c0_34 = arith.constant 0 : index
    %96 = vector.load %arg3[%c11, %c0_34] : memref<16x128xf32, #tpu.memory_space<vmem>>, vector<1x128xf32>
    tpu.vector_store %arg3[%c11, %c0_34], %95 {strides = array<i32>} : memref<16x128xf32, #tpu.memory_space<vmem>>, vector<1x128xf32>,
    %c12_i32 = arith.constant 12 : i32
    %97 = arith.addi %0, %c12_i32 : i32
    %98 = arith.index_cast %97 : i32 to index
    %99 = memref.load %arg1[%98] : memref<16xi32, #tpu.memory_space<smem>>
    %100 = arith.index_cast %99 : i32 to index
    %c0_35 = arith.constant 0 : index
    %101 = vector.load %arg2[%100, %c0_35] : memref<128x128xf32, #tpu.memory_space<vmem>>, vector<1x128xf32>
    %cst_36 = arith.constant 11.3137083 : f32
    %102 = vector.broadcast %cst_36 : f32 to vector<1x128xf32>
    %103 = arith.mulf %101, %102 : vector<1x128xf32>
    %c12 = arith.constant 12 : index
    %c0_37 = arith.constant 0 : index
    %104 = vector.load %arg3[%c12, %c0_37] : memref<16x128xf32, #tpu.memory_space<vmem>>, vector<1x128xf32>
    tpu.vector_store %arg3[%c12, %c0_37], %103 {strides = array<i32>} : memref<16x128xf32, #tpu.memory_space<vmem>>, vector<1x128xf32>,
    %c13_i32 = arith.constant 13 : i32
    %105 = arith.addi %0, %c13_i32 : i32
    %106 = arith.index_cast %105 : i32 to index
    %107 = memref.load %arg1[%106] : memref<16xi32, #tpu.memory_space<smem>>
    %108 = arith.index_cast %107 : i32 to index
    %c0_38 = arith.constant 0 : index
    %109 = vector.load %arg2[%108, %c0_38] : memref<128x128xf32, #tpu.memory_space<vmem>>, vector<1x128xf32>
    %cst_39 = arith.constant 11.3137083 : f32
    %110 = vector.broadcast %cst_39 : f32 to vector<1x128xf32>
    %111 = arith.mulf %109, %110 : vector<1x128xf32>
    %c13 = arith.constant 13 : index
    %c0_40 = arith.constant 0 : index
    %112 = vector.load %arg3[%c13, %c0_40] : memref<16x128xf32, #tpu.memory_space<vmem>>, vector<1x128xf32>
    tpu.vector_store %arg3[%c13, %c0_40], %111 {strides = array<i32>} : memref<16x128xf32, #tpu.memory_space<vmem>>, vector<1x128xf32>,
    %c14_i32 = arith.constant 14 : i32
    %113 = arith.addi %0, %c14_i32 : i32
    %114 = arith.index_cast %113 : i32 to index
    %115 = memref.load %arg1[%114] : memref<16xi32, #tpu.memory_space<smem>>
    %116 = arith.index_cast %115 : i32 to index
    %c0_41 = arith.constant 0 : index
    %117 = vector.load %arg2[%116, %c0_41] : memref<128x128xf32, #tpu.memory_space<vmem>>, vector<1x128xf32>
    %cst_42 = arith.constant 11.3137083 : f32
    %118 = vector.broadcast %cst_42 : f32 to vector<1x128xf32>
    %119 = arith.mulf %117, %118 : vector<1x128xf32>
    %c14 = arith.constant 14 : index
    %c0_43 = arith.constant 0 : index
    %120 = vector.load %arg3[%c14, %c0_43] : memref<16x128xf32, #tpu.memory_space<vmem>>, vector<1x128xf32>
    tpu.vector_store %arg3[%c14, %c0_43], %119 {strides = array<i32>} : memref<16x128xf32, #tpu.memory_space<vmem>>, vector<1x128xf32>,
    %c15_i32 = arith.constant 15 : i32
    %121 = arith.addi %0, %c15_i32 : i32
    %122 = arith.index_cast %121 : i32 to index
    %123 = memref.load %arg1[%122] : memref<16xi32, #tpu.memory_space<smem>>
    %124 = arith.index_cast %123 : i32 to index
    %c0_44 = arith.constant 0 : index
    %125 = vector.load %arg2[%124, %c0_44] : memref<128x128xf32, #tpu.memory_space<vmem>>, vector<1x128xf32>
    %cst_45 = arith.constant 11.3137083 : f32
    %126 = vector.broadcast %cst_45 : f32 to vector<1x128xf32>
    %127 = arith.mulf %125, %126 : vector<1x128xf32>
    %c15 = arith.constant 15 : index
    %c0_46 = arith.constant 0 : index
    %128 = vector.load %arg3[%c15, %c0_46] : memref<16x128xf32, #tpu.memory_space<vmem>>, vector<1x128xf32>
    tpu.vector_store %arg3[%c15, %c0_46], %127 {strides = array<i32>} : memref<16x128xf32, #tpu.memory_space<vmem>>, vector<1x128xf32>,
    return
  }
  func.func @transform_0(%arg0: i32, %arg1: memref<16xi32, #tpu.memory_space<smem>>) -> (i32, i32) {
    %c0_i32 = arith.constant 0 : i32
    %c0_i32_0 = arith.constant 0 : i32
    %c0_i32_1 = arith.constant 0 : i32
    return %c0_i32, %c0_i32_0 : i32, i32
  }
  func.func @transform_1(%arg0: i32, %arg1: memref<16xi32, #tpu.memory_space<smem>>) -> (i32, i32) {
    %c0_i32 = arith.constant 0 : i32
    %c0_i32_0 = arith.constant 0 : i32
    return %arg0, %c0_i32 : i32, i32
  }
}

</mosaic_0001>

<bundles_post_ra>
// kernel: tpu_custom_call.1
= control target key start
LH: loop header
LB: loop body
LE: loop exit
PB: predicated region body
PF: predicated region fallthrough
CT: control target
= control target key end

     0   :  { %s317_s0 = inlined_call_operand.hbm [shape: s32[16], index: 0, kind: input, shape index: {}]   ;;  %s318_s1 = inlined_call_operand.hbm [shape: f32[128,128], index: 1, kind: input, shape index: {}]   ;;  %s319_s2 = inlined_call_operand.hbm [shape: f32[16,128], index: 2, kind: output, shape index: {}]  }
   0x1   :  { %s177_s11 = scalar_lea.hbm %s317_s0, 16 }
   0x2   :  { %p178_p0 = scmp.ne.s32.totalorder %s317_s0, %s177_s11  ;;  %p181_p1 = scmp.lt.u32.totalorder %s177_s11, %s317_s0 }
   0x4   :  { %p183_p2 = pnand %p181_p1, %p178_p0 }
   0x6   :  { %186 = shalt.err (!%p183_p2)  }
   0x7   :  { %s237_s16 = smov [#allocation3]  }
   0x8   :  { %8 = dma.hbm_to_smem %s317_s0, 16, %s237_s16, [#allocation2] }
   0x9   :  { %231 = dma.done.wait [#allocation2], 16 }
   0xa   :  { %232 = vsyncadd [#allocation2], 4294967280 }
   0xb   :  { %10 = sfence }
   0xc   :  { %11 = vsyncpa [#allocation5], 0 }
   0xd   :  { %12 = vsyncpa [#allocation6], 0  ;;  %s238_s19 = smov [#allocation4]   ;;  %s187_s23 = scalar_lea.hbm %s318_s1, 2048 }
   0xe   :  { %s18_s20 = sshll.u32 %s238_s19, 4  ;;  %p188_p3 = scmp.ne.s32.totalorder %s318_s1, %s187_s23  ;;  %s19_s20 = int_to_ptr.vmem [resolvable:$true] %s18_s20 }
   0xf   :  { %p191_p4 = scmp.lt.u32.totalorder %s187_s23, %s318_s1 }
  0x11   :  { %p193_p5 = pnand %p191_p4, %p188_p3 }
  0x13   :  { %196 = shalt.err (!%p193_p5)
}
  0x14   :  { %s197_s0 = scalar_lea.vmem %s19_s20, 2048  ;;  %p202_p7 = scmp.lt.s32.totalorder %s19_s20, %s19_s20 }
  0x15   :  { %p198_p6 = scmp.ne.s32.totalorder %s19_s20, %s197_s0  ;;  %p203_p8 = scmp.lt.s32.totalorder %s197_s0, %s197_s0 }
  0x17   :  { %p204_p9 = por %p203_p8, %p202_p7 }
  0x19   :  { %p205_p10 = pnand %p204_p9, %p198_p6 }
  0x1b   :  { %208 = shalt.err (!%p205_p10)
}
  0x1c   :  { %s239_s28 = smov 128   ;;  %s240_s29 = smov 8  }
  0x1d   :  { %24 = dma.hbm_to_vmem [thread:$0]  %s318_s1, 2048, %s19_s20, [#allocation5], %s239_s28, %s239_s28, %s240_s29  }
  0x1e   :  { %233 = dma.done.wait [#allocation5], 2048  }
  0x1f   :  { %234 = vsyncadd [#allocation5], 4294965248  ;;  %s29_s4 = sld [smem:[#allocation3]]  ;;  %s157_s5 = sld [smem:[#allocation3 + $0x1]] }
  0x20   :  { %s158_s6 = sld [smem:[#allocation3 + $0x2]]  ;;  %s159_s7 = sld [smem:[#allocation3 + $0x3]] }
  0x21   :  { %s160_s8 = sld [smem:[#allocation3 + $0x4]]  ;;  %s161_s9 = sld [smem:[#allocation3 + $0x5]] }
  0x22   :  { %s284_s10 = sld [smem:[#allocation3 + $0x6]]  ;;  %s286_s11 = sld [smem:[#allocation3 + $0x7]] }
  0x23   :  { %s288_s12 = sld [smem:[#allocation3 + $0x8]]  ;;  %s290_s13 = sld [smem:[#allocation3 + $0x9]] }
  0x24   :  { %s292_s14 = sld [smem:[#allocation3 + $0xa]]  ;;  %s294_s15 = sld [smem:[#allocation3 + $0xb]] }
  0x25   :  { %s30_s1 = scalar_lea.vmem [#allocation4], %s29_s4  ;;  %s36_s16 = scalar_lea.vmem [#allocation4], %s157_s5 }
  0x26   :  { %v31_v0 = vld [vmem:[%s30_s1] sm:$0x1]  ;;  %s42_s17 = scalar_lea.vmem [#allocation4], %s158_s6  ;;  %s48_s18 = scalar_lea.vmem [#allocation4], %s159_s7 }
  0x27   :  { %v37_v1 = vld [vmem:[%s36_s16] sm:$0x1]  ;;  %v32_v2 = vmul.f32 11.313708, %v31_v0  ;;  %s54_s19 = scalar_lea.vmem [#allocation4], %s160_s8  ;;  %s60_s20 = scalar_lea.vmem [#allocation4], %s161_s9 }
  0x28   :  { %v38_v3 = vmul.f32 11.313708, %v37_v1  ;;  %v43_v4 = vld [vmem:[%s42_s17] sm:$0x1]  ;;  %s66_s21 = scalar_lea.vmem [#allocation4], %s284_s10  ;;  %s72_s22 = scalar_lea.vmem [#allocation4], %s286_s11 }
  0x29   :  { %v44_v5 = vmul.f32 11.313708, %v43_v4  ;;  %v49_v6 = vld [vmem:[%s48_s18] sm:$0x1]  ;;  %33 = vst [vmem:[#allocation7] sm:$0x1] %v32_v2 }
  0x2a   :  { %39 = vst [vmem:[#allocation7 + $0x1] sm:$0x1] %v38_v3  ;;  %v50_v7 = vmul.f32 11.313708, %v49_v6  ;;  %v55_v8 = vld [vmem:[%s54_s19] sm:$0x1] }
  0x2b   :  { %v61_v9 = vld [vmem:[%s60_s20] sm:$0x1]  ;;  %45 = vst [vmem:[#allocation7 + $0x2] sm:$0x1] %v44_v5  ;;  %v56_v10 = vmul.f32 11.313708, %v55_v8 }
  0x2c   :  { %v62_v11 = vmul.f32 11.313708, %v61_v9  ;;  %51 = vst [vmem:[#allocation7 + $0x3] sm:$0x1] %v50_v7  ;;  %v67_v12 = vld [vmem:[%s66_s21] sm:$0x1] }
  0x2d   :  { %v73_v13 = vld [vmem:[%s72_s22] sm:$0x1]  ;;  %57 = vst [vmem:[#allocation7 + $0x4] sm:$0x1] %v56_v10  ;;  %v68_v14 = vmul.f32 11.313708, %v67_v12 }
  0x2e   :  { %63 = vst [vmem:[#allocation7 + $0x5] sm:$0x1] %v62_v11  ;;  %v74_v15 = vmul.f32 11.313708, %v73_v13  ;;  %s78_s23 = scalar_lea.vmem [#allocation4], %s288_s12  ;;  %s84_s24 = scalar_lea.vmem [#allocation4], %s290_s13 }
  0x2f   :  { %v79_v16 = vld [vmem:[%s78_s23] sm:$0x1]  ;;  %69 = vst [vmem:[#allocation7 + $0x6] sm:$0x1] %v68_v14  ;;  %s90_s25 = scalar_lea.vmem [#allocation4], %s292_s14  ;;  %s96_s26 = scalar_lea.vmem [#allocation4], %s294_s15 }
  0x30   :  { %v80_v17 = vmul.f32 11.313708, %v79_v16  ;;  %v85_v18 = vld [vmem:[%s84_s24] sm:$0x1]  ;;  %75 = vst [vmem:[#allocation7 + $0x7] sm:$0x1] %v74_v15 }
  0x31   :  { %v86_v19 = vmul.f32 11.313708, %v85_v18  ;;  %v91_v20 = vld [vmem:[%s90_s25] sm:$0x1]  ;;  %s168_s27 = sld [smem:[#allocation3 + $0xc]]  ;;  %s169_s0 = sld [smem:[#allocation3 + $0xd]] }
  0x32   :  { %v97_v21 = vld [vmem:[%s96_s26] sm:$0x1]  ;;  %81 = vst [vmem:[#allocation7 + $0x8] sm:$0x1] %v80_v17  ;;  %v92_v22 = vmul.f32 11.313708, %v91_v20 }
  0x33   :  { %v98_v23 = vmul.f32 11.313708, %v97_v21  ;;  %87 = vst [vmem:[#allocation7 + $0x9] sm:$0x1] %v86_v19  ;;  %s170_s30 = sld [smem:[#allocation3 + $0xe]]  ;;  %s171_s3 = sld [smem:[#allocation3 + $0xf]] }
  0x34   :  { %93 = vst [vmem:[#allocation7 + $0xa] sm:$0x1] %v92_v22  ;;  %s241_s4 = smov [#allocation7]  }
  0x35   :  { %99 = vst [vmem:[#allocation7 + $0xb] sm:$0x1] %v98_v23  ;;  %s129_s5 = sshll.u32 %s241_s4, 4  ;;  %s130_s5 = int_to_ptr.vmem [resolvable:$true] %s129_s5 }
  0x36   :  { %s209_s10 = scalar_lea.vmem %s130_s5, 256  ;;  %p214_p12 = scmp.lt.s32.totalorder %s130_s5, %s130_s5 }
  0x37   :  { %s102_s6 = scalar_lea.vmem [#allocation4], %s168_s27  ;;  %s108_s7 = scalar_lea.vmem [#allocation4], %s169_s0 }
  0x38   :  { %v103_v24 = vld [vmem:[%s102_s6] sm:$0x1]  ;;  %p210_p11 = scmp.ne.s32.totalorder %s130_s5, %s209_s10  ;;  %p215_p13 = scmp.lt.s32.totalorder %s209_s10, %s209_s10 }
  0x39   :  { %v104_v25 = vmul.f32 11.313708, %v103_v24  ;;  %v109_v26 = vld [vmem:[%s108_s7] sm:$0x1]  ;;  %s114_s8 = scalar_lea.vmem [#allocation4], %s170_s30  ;;  %s120_s9 = scalar_lea.vmem [#allocation4], %s171_s3 }
  0x3a   :  { %v115_v27 = vld [vmem:[%s114_s8] sm:$0x1]  ;;  %v110_v28 = vmul.f32 11.313708, %v109_v26  ;;  %p216_p0 = por %p215_p13, %p214_p12 }
  0x3b   :  { %v116_v29 = vmul.f32 11.313708, %v115_v27  ;;  %105 = vst [vmem:[#allocation7 + $0xc] sm:$0x1] %v104_v25  ;;  %v121_v30 = vld [vmem:[%s120_s9] sm:$0x1] }
  0x3c   :  { %111 = vst [vmem:[#allocation7 + $0xd] sm:$0x1] %v110_v28  ;;  %v122_v31 = vmul.f32 11.313708, %v121_v30  ;;  %p217_p1 = pnand %p216_p0, %p210_p11 }
  0x3d   :  { %117 = vst [vmem:[#allocation7 + $0xe] sm:$0x1] %v116_v29 }
  0x3e   :  { %123 = vst [vmem:[#allocation7 + $0xf] sm:$0x1] %v122_v31 }
  0x3f   :  { %220 = shalt.err (!%p217_p1)
}
  0x40   :  { %s221_s13 = scalar_lea.hbm %s319_s2, 256 }
  0x41   :  { %p222_p2 = scmp.ne.s32.totalorder %s319_s2, %s221_s13  ;;  %p225_p3 = scmp.lt.u32.totalorder %s221_s13, %s319_s2 }
  0x43   :  { %p227_p4 = pnand %p225_p3, %p222_p2 }
  0x45   :  { %230 = shalt.err (!%p227_p4)
}
  0x46   :  { %135 = dma.vmem_to_hbm [thread:$0]  %s130_s5, 256, %s319_s2, [#allocation6], %s239_s28, %s239_s28, %s240_s29  }
  0x47   :  { %235 = dma.done.wait [#allocation6], 256  }
  0x48   :  { %236 = vsyncadd [#allocation6], 4294967040 }
  0x49   :  { %139 = vsyncpa [#allocation5], 1 }
  0x4a   :  { %140 = vsyncpa [#allocation6], 1 }

</bundles_post_ra>
